<compile_context>
chip_gen: v7x
topology: tpu7x:2x2x1
jax: 0.10.0
libtpu: 0.0.40
codegen_flags: <defaults>
</compile_context>

<pallas_src>
import functools

import jax
import jax.numpy as jnp
from jax import lax
from jax.experimental import pallas as pl
from jax.experimental.pallas import tpu as pltpu


def _ls_ce_partial_kernel(tgt_ref, x_ref, out_ref, *, n_true: int, eps: float,
                          tile_rows: int):
    # tgt_ref: (TN, 1) int32   x_ref: (TN, C) logits   out_ref: (1, 8, 128) f32
    i = pl.program_id(0)
    x = x_ref[...].astype(jnp.float32)                       # (TN, C)
    tn, c = x.shape

    # Rows past the true batch size: either explicit padding-free ragged last block
    # (Pallas block padding holds garbage) -- clamp them to 0 BEFORE exp so inf/NaN
    # can never leak through the final mask (0 * inf == NaN).
    row = i * tile_rows + lax.broadcasted_iota(jnp.int32, (tn, 1), 0)
    valid = row < n_true                                      # (TN, 1) bool
    x = jnp.where(valid, x, 0.0)

    # Lane reductions: max, sum(exp(shifted)), rowsum.  exp runs on the EUP slot.
    m = jnp.max(x, axis=-1, keepdims=True)                    # (TN, 1)
    lse = jnp.log(jnp.sum(jnp.exp(x - m), axis=-1, keepdims=True))
    rowsum = jnp.sum(x, axis=-1, keepdims=True)               # (TN, 1)

    # Target-logit extraction without a one-hot / weight tile: masked lane reduction.
    col = lax.broadcasted_iota(jnp.int32, (tn, c), 1)
    x_tgt = jnp.sum(jnp.where(col == tgt_ref[...], x, 0.0), axis=-1, keepdims=True)

    inv_n = 1.0 / n_true
    contrib = (m + lse) * inv_n \
        - ((1.0 - eps) * inv_n) * x_tgt \
        - (eps * inv_n / c) * rowsum
    contrib = jnp.where(valid, contrib, 0.0)                  # (TN, 1)

    p = jnp.sum(contrib)                                      # scalar per-tile partial
    out_ref[...] = jnp.broadcast_to(p.reshape(1, 1, 1), out_ref.shape).astype(jnp.float32)


def label_smoothing_cross_entropy(x, target, eps: float = 0.001):
    """x: (N, C) float logits (f32 or bf16); target: (N,) int class ids. Returns scalar f32."""
    n, c = x.shape
    in_itemsize = jnp.dtype(x.dtype).itemsize

    # Device-aware VMEM capacity (v5e/v6e: 128 MiB, v7x: 64 MiB per TC).
    try:
        vmem_cap = int(pltpu.get_tpu_info().vmem_capacity_bytes)
    except Exception:
        vmem_cap = 64 << 20  # conservative fallback (v7x-sized)

    # Per-row VMEM footprint: double-buffered input rows + ~4 full-width f32
    # intermediates (f32 upcast, exp path, iota/select) + double-buffered
    # lane-padded (128-wide) i32 target rows.
    per_row_vmem = 2 * c * in_itemsize + 4 * c * 4 + 2 * 128 * 4
    # Total working-set target: leave headroom below physical VMEM.
    vmem_target = min(vmem_cap - (8 << 20), 96 << 20)
    # Per-logits-buffer DMA tile budget: ~8 MiB on 128 MiB parts, ~4 MiB on v7x.
    buf_budget = (8 << 20) if vmem_cap >= (100 << 20) else (4 << 20)

    tn = min((vmem_target - (2 << 20)) // per_row_vmem,
             buf_budget // max(1, c * in_itemsize))
    tn = max(8, min(8192, (tn // 8) * 8))
    # Never tile past the (8-rounded) batch; no jnp.pad of x -- the last block is
    # ragged and masked/clamped inside the kernel.
    tn = min(tn, max(8, pl.cdiv(n, 8) * 8))
    # Keep >= 2 grid steps when possible: megacore sharding on v7x + DMA/compute overlap.
    while tn > 8 and pl.cdiv(n, tn) < 2:
        tn = max(8, ((tn // 2) // 8) * 8)
    num_tiles = pl.cdiv(n, tn)

    vmem_limit = int(max(16 << 20, min(tn * per_row_vmem + (2 << 20), vmem_target)))

    tgt = target.astype(jnp.int32).reshape(n, 1)

    cost = pl.CostEstimate(
        flops=6 * n * c,
        transcendentals=n * c,
        bytes_accessed=n * c * in_itemsize + n * 4 + num_tiles * 8 * 128 * 4,
    )

    out = pl.pallas_call(
        functools.partial(_ls_ce_partial_kernel, n_true=n, eps=float(eps),
                          tile_rows=tn),
        out_shape=jax.ShapeDtypeStruct((num_tiles, 8, 128), jnp.float32),
        grid=(num_tiles,),
        in_specs=[
            pl.BlockSpec((tn, 1), lambda i: (i, 0)),   # target tile
            pl.BlockSpec((tn, c), lambda i: (i, 0)),   # logits tile (full C in lanes)
        ],
        out_specs=pl.BlockSpec((1, 8, 128), lambda i: (i, 0, 0)),
        compiler_params=pltpu.CompilerParams(
            dimension_semantics=("parallel",),         # tiles independent -> both TCs on v7x
            vmem_limit_bytes=vmem_limit,
        ),
        cost_estimate=cost,
    )(tgt, x)

    # Tiny final reduction of per-tile partials (eps blend and 1/N already folded in).
    return jnp.sum(out[:, 0, 0])


def _reference(x, target, eps: float = 0.001):
    log_probs = jax.nn.log_softmax(x.astype(jnp.float32), axis=-1)
    h_pq = -jnp.take_along_axis(log_probs, target[:, None].astype(jnp.int32), axis=-1)[:, 0]
    h_uq = -jnp.mean(log_probs)
    return jnp.mean((1.0 - eps) * h_pq + eps * h_uq)


if __name__ == "__main__":
    key = jax.random.PRNGKey(0)
    k1, k2, k3, k4, k5, k6 = jax.random.split(key, 6)

    # Case 1: batch of 8 logits over 32 classes (single tile).
    N, C = 8, 32
    x = jax.random.normal(k1, (N, C), dtype=jnp.float32)
    target = jax.random.randint(k2, (N,), 0, C, dtype=jnp.int32)
    loss = jax.block_until_ready(label_smoothing_cross_entropy(x, target, eps=0.001))
    ref = _reference(x, target, eps=0.001)
    assert jnp.allclose(loss, ref, atol=1e-5, rtol=1e-5), (loss, ref)

    # Case 2: ragged last tile (N not a multiple of the row tile), non-128 C, multi-tile grid.
    N2, C2 = 13, 160
    x2 = jax.random.normal(k3, (N2, C2), dtype=jnp.float32)
    target2 = jax.random.randint(k4, (N2,), 0, C2, dtype=jnp.int32)
    loss2 = jax.block_until_ready(label_smoothing_cross_entropy(x2, target2, eps=0.001))
    ref2 = _reference(x2, target2, eps=0.001)
    assert jnp.allclose(loss2, ref2, atol=1e-5, rtol=1e-5), (loss2, ref2)

    # Case 3: bf16 logits (f32 accumulation in-kernel).
    N3, C3 = 24, 100
    x3 = jax.random.normal(k5, (N3, C3), dtype=jnp.float32).astype(jnp.bfloat16)
    target3 = jax.random.randint(k6, (N3,), 0, C3, dtype=jnp.int32)
    loss3 = jax.block_until_ready(label_smoothing_cross_entropy(x3, target3, eps=0.001))
    ref3 = _reference(x3, target3, eps=0.001)
    assert jnp.allclose(loss3, ref3, atol=1e-4, rtol=1e-4), (loss3, ref3)

    print("KERNEL_OK")
</pallas_src>

<mosaic_0001>
module attributes {stable_mosaic.version = 11 : i64} {
  func.func @_ls_ce_partial_kernel(%arg0: i32, %arg1: memref<8x1xi32, #tpu.memory_space<vmem>>, %arg2: memref<8x32xf32, #tpu.memory_space<vmem>>, %arg3: memref<1x8x128xf32, #tpu.memory_space<vmem>>) attributes {dimension_semantics = [#tpu.dimension_semantics<parallel>], iteration_bounds = array<i64: 1>, scalar_prefetch = 0 : i64, scratch_operands = 0 : i64, tpu.core_type = #tpu.core_type<tc>, window_params = [{transform_indices = @transform_0, window_bounds = array<i64: 8, 1>}, {transform_indices = @transform_1, window_bounds = array<i64: 8, 32>}, {transform_indices = @transform_2, window_bounds = array<i64: 1, 8, 128>}]} {
    %c0 = arith.constant 0 : index
    %c0_0 = arith.constant 0 : index
    %0 = vector.load %arg2[%c0, %c0_0] : memref<8x32xf32, #tpu.memory_space<vmem>>, vector<8x32xf32>
    %c8_i32 = arith.constant 8 : i32
    %1 = arith.muli %arg0, %c8_i32 : i32
    %2 = tpu.iota {dimensions = array<i32: 0>} : vector<8x1xi32>
    %3 = vector.broadcast %1 : i32 to vector<8x1xi32>
    %4 = arith.addi %3, %2 : vector<8x1xi32>
    %c8_i32_1 = arith.constant 8 : i32
    %5 = vector.broadcast %c8_i32_1 : i32 to vector<8x1xi32>
    %6 = arith.cmpi slt, %4, %5 : vector<8x1xi32>
    %cst = arith.constant 0.000000e+00 : f32
    %7 = vector.shape_cast %6 : vector<8x1xi1> to vector<8x1xi1>
    %8 = vector.broadcast %7 : vector<8x1xi1> to vector<8x32xi1>
    %9 = vector.broadcast %cst : f32 to vector<8x32xf32>
    %10 = arith.select %8, %0, %9 : vector<8x32xi1>, vector<8x32xf32>
    %cst_2 = arith.constant dense<0xFF800000> : vector<8xf32>
    %11 = vector.multi_reduction <maximumf>, %10, %cst_2 [1] : vector<8x32xf32> to vector<8xf32>
    %12 = vector.shape_cast %11 : vector<8xf32> to vector<8x1xf32>
    %13 = vector.broadcast %12 : vector<8x1xf32> to vector<8x32xf32>
    %14 = arith.subf %10, %13 : vector<8x32xf32>
    %15 = math.exp %14 : vector<8x32xf32>
    %cst_3 = arith.constant dense<0.000000e+00> : vector<8xf32>
    %16 = vector.multi_reduction <add>, %15, %cst_3 [1] : vector<8x32xf32> to vector<8xf32>
    %17 = vector.shape_cast %16 : vector<8xf32> to vector<8x1xf32>
    %18 = math.log %17 : vector<8x1xf32>
    %cst_4 = arith.constant dense<0.000000e+00> : vector<8xf32>
    %19 = vector.multi_reduction <add>, %10, %cst_4 [1] : vector<8x32xf32> to vector<8xf32>
    %20 = vector.shape_cast %19 : vector<8xf32> to vector<8x1xf32>
    %21 = tpu.iota {dimensions = array<i32: 1>} : vector<8x32xi32>
    %c0_5 = arith.constant 0 : index
    %c0_6 = arith.constant 0 : index
    %22 = vector.load %arg1[%c0_5, %c0_6] : memref<8x1xi32, #tpu.memory_space<vmem>>, vector<8x1xi32>
    %23 = vector.broadcast %22 : vector<8x1xi32> to vector<8x32xi32>
    %24 = arith.cmpi eq, %21, %23 : vector<8x32xi32>
    %cst_7 = arith.constant 0.000000e+00 : f32
    %25 = vector.broadcast %cst_7 : f32 to vector<8x32xf32>
    %26 = arith.select %24, %10, %25 : vector<8x32xi1>, vector<8x32xf32>
    %cst_8 = arith.constant dense<0.000000e+00> : vector<8xf32>
    %27 = vector.multi_reduction <add>, %26, %cst_8 [1] : vector<8x32xf32> to vector<8xf32>
    %28 = vector.shape_cast %27 : vector<8xf32> to vector<8x1xf32>
    %29 = arith.addf %12, %18 : vector<8x1xf32>
    %cst_9 = arith.constant 1.250000e-01 : f32
    %30 = vector.broadcast %cst_9 : f32 to vector<8x1xf32>
    %31 = arith.mulf %29, %30 : vector<8x1xf32>
    %cst_10 = arith.constant 1.248750e-01 : f32
    %32 = vector.broadcast %cst_10 : f32 to vector<8x1xf32>
    %33 = arith.mulf %32, %28 : vector<8x1xf32>
    %34 = arith.subf %31, %33 : vector<8x1xf32>
    %cst_11 = arith.constant 3.906250e-06 : f32
    %35 = vector.broadcast %cst_11 : f32 to vector<8x1xf32>
    %36 = arith.mulf %35, %20 : vector<8x1xf32>
    %37 = arith.subf %34, %36 : vector<8x1xf32>
    %cst_12 = arith.constant 0.000000e+00 : f32
    %38 = vector.broadcast %cst_12 : f32 to vector<8x1xf32>
    %39 = arith.select %6, %37, %38 : vector<8x1xi1>, vector<8x1xf32>
    %40 = vector.shape_cast %39 : vector<8x1xf32> to vector<1x8x1xf32>
    %cst_13 = arith.constant dense<0.000000e+00> : vector<1xf32>
    %41 = vector.multi_reduction <add>, %40, %cst_13 [1, 2] : vector<1x8x1xf32> to vector<1xf32>
    %42 = vector.shape_cast %41 : vector<1xf32> to vector<1x1x1xf32>
    %43 = vector.extract %42[0, 0, 0] : f32 from vector<1x1x1xf32>
    %44 = vector.broadcast %43 : f32 to vector<1x1x1xf32>
    %45 = vector.shape_cast %44 : vector<1x1x1xf32> to vector<1x1x1xf32>
    %46 = vector.broadcast %45 : vector<1x1x1xf32> to vector<1x8x128xf32>
    %c0_14 = arith.constant 0 : index
    %c0_15 = arith.constant 0 : index
    %c0_16 = arith.constant 0 : index
    %47 = vector.load %arg3[%c0_14, %c0_15, %c0_16] : memref<1x8x128xf32, #tpu.memory_space<vmem>>, vector<1x8x128xf32>
    tpu.vector_store %arg3[%c0_14, %c0_15, %c0_16], %46 {strides = array<i32>} : memref<1x8x128xf32, #tpu.memory_space<vmem>>, vector<1x8x128xf32>,
    return
  }
  func.func @transform_0(%arg0: i32) -> (i32, i32) {
    %c0_i32 = arith.constant 0 : i32
    %c0_i32_0 = arith.constant 0 : i32
    return %arg0, %c0_i32 : i32, i32
  }
  func.func @transform_1(%arg0: i32) -> (i32, i32) {
    %c0_i32 = arith.constant 0 : i32
    %c0_i32_0 = arith.constant 0 : i32
    return %arg0, %c0_i32 : i32, i32
  }
  func.func @transform_2(%arg0: i32) -> (i32, i32, i32) {
    %c0_i32 = arith.constant 0 : i32
    %c0_i32_0 = arith.constant 0 : i32
    %c0_i32_1 = arith.constant 0 : i32
    return %arg0, %c0_i32, %c0_i32_0 : i32, i32, i32
  }
}

</mosaic_0001>

<bundles_post_ra>
// kernel: tpu_custom_call.1
= control target key start
LH: loop header
LB: loop body
LE: loop exit
PB: predicated region body
PF: predicated region fallthrough
CT: control target
= control target key end

     0   :  { %vm22_vm0 = vcmask 261120   ;;  %s154_s0 = inlined_call_operand.vmem [shape: s32[8,1], index: 0, kind: input, shape index: {}]   ;;  %s155_s1 = inlined_call_operand.vmem [shape: f32[8,32], index: 1, kind: input, shape index: {}]   ;;  %s156_s2 = inlined_call_operand.hbm [shape: f32[1,8,128], index: 2, kind: output, shape index: {}]  }
   0x1   :  { %v12_v0 = vld [vmem:[%s155_s1] sm:$0xff] }
   0x2   :  { %7 = vsyncpa [#allocation3], 0  ;;  %v23_v1 = vsel %vm22_vm0, %v12_v0, -inf  ;;  %v115_v2 = vmov 0   ;;  %v39_v3 = vld [vmem:[%s154_s0] sm:$0xff]  ;;  %v37_v7 = vlaneseq  ;;  %v34_v14 = vsel %vm22_vm0, %v12_v0, 0.0 }
   0x3   :  { %86 = vset.pattern.permute.xlu0 %v115_v2  ;;  %vm55_vm2 = vcmask 7168   ;;  %s116_s0 = smov [#allocation2]  }
   0x4   :  { %24 = vmax.xlane.f32.xlu0 %v23_v1  ;;  %v38_v8 = vand.u32 127, %v37_v7  ;;  %s74_s1 = sshll.u32 %s116_s0, 4  ;;  %s75_s1 = int_to_ptr.vmem [resolvable:$true] %s74_s1 }
   0x5   :  { %s91_s14 = scalar_lea.vmem %s75_s1, 128  ;;  %p96_p1 = scmp.lt.s32.totalorder %s75_s1, %s75_s1 }
   0x6   :  { %p92_p0 = scmp.ne.s32.totalorder %s75_s1, %s91_s14  ;;  %p97_p2 = scmp.lt.s32.totalorder %s91_s14, %s91_s14 }
   0x8   :  { %p98_p3 = por %p97_p2, %p96_p1 }
   0xa   :  { %p99_p4 = pnand %p98_p3, %p92_p0 }
  0x1a   :  { %41 = vperm.xlu0 %86, %v39_v3  }
  0x91   :  { %v25_v4 = vpop.xlane.xlu0 %24 }
  0x92   :  { %v26_v5 = vsub.f32 %v12_v0, %v25_v4 }
  0x94   :  { %v27_v6 = vmul.f32 1.442695, %v26_v5 }
  0x96   :  { %87 = vpow2.f32 %v27_v6 }
  0x99   :  { %v42_v9 = vpop.permute.xlu0 %41 }
  0x9a   :  { %vm43_vm1 = vcmp.eq.s32.totalorder %v38_v8, %v42_v9 }
  0x9b   :  { %v44_v11 = vsel %vm43_vm1, %v12_v0, 0.0 }
  0x9c   :  { %v45_v13 = vsel %vm22_vm0, %v44_v11, 0.0 }
  0xa0   :  { %v88_v10 = vpop.eup %87 }
  0xa1   :  { %v29_v12 = vsel %vm22_vm0, %v88_v10, 0.0 }
  0xa2   :  { %30 = vadd.xlane.f32.xlu1 %v29_v12 }
  0xa6   :  { %46 = vadd.xlane.f32.xlu1 %v45_v13 }
  0xaa   :  { %35 = vadd.xlane.f32.xlu1 %v34_v14 }
 0x12f   :  { %v31_v15 = vpop.xlane.xlu1 %30 }
 0x130   :  { %89 = vlog2.f32 %v31_v15 }
 0x133   :  { %v47_v16 = vpop.xlane.xlu1 %46 }
 0x134   :  { %v50_v22 = vmul.f32 0.124875, %v47_v16 }
 0x137   :  { %v36_v19 = vpop.xlane.xlu1 %35 }
 0x138   :  { %v52_v23 = vmul.f32 3.90625e-06, %v36_v19 }
 0x13a   :  { %v90_v17 = vpop.eup %89 }
 0x13b   :  { %v33_v18 = vmul.f32 0.6931472, %v90_v17 }
 0x13d   :  { %v48_v20 = vadd.f32 %v33_v18, %v25_v4 }
 0x13f   :  { %v49_v21 = vmul.f32 0.125, %v48_v20 }
 0x141   :  { %v51_v24 = vsub.f32 %v49_v21, %v50_v22 }
 0x143   :  { %v53_v25 = vsub.f32 %v51_v24, %v52_v23 }
 0x145   :  { %v56_v26 = vsel %vm55_vm2, %v53_v25, 0.0 }
 0x146   :  { %57 = vadd.xlane.f32.xlu1 %v56_v26 }
 0x1d3   :  { %v58_v27 = vpop.xlane.xlu1 %57 }
 0x1d4   :  { %v59_v28 = vrot.slane %v58_v27, 4 }
 0x1d6   :  { %v60_v29 = vadd.f32 %v59_v28, %v58_v27 }
 0x1d8   :  { %v61_v30 = vrot.slane %v60_v29, 2 }
 0x1da   :  { %v62_v31 = vadd.f32 %v61_v30, %v60_v29 }
 0x1dc   :  { %v63_v32 = vrot.slane %v62_v31, 1 }
 0x1de   :  { %v64_v33 = vadd.f32 %v63_v32, %v62_v31 }
 0x1e0   :  { %82 = vpush %v64_v33 }
 0x211   :  { %s83_s13 = spop %82 }
 0x212   :  { %v66_v34 = vstv %s83_s13 }
 0x213   :  { %67 = vst [vmem:[#allocation2] sm:$0xff] %v66_v34 }
 0x214   :  { %102 = shalt.err (!%p99_p4)
}
 0x215   :  { %s103_s17 = scalar_lea.hbm %s156_s2, 128 }
 0x216   :  { %p104_p5 = scmp.ne.s32.totalorder %s156_s2, %s103_s17  ;;  %p107_p6 = scmp.lt.u32.totalorder %s103_s17, %s156_s2 }
 0x218   :  { %p109_p7 = pnand %p107_p6, %p104_p5 }
 0x21a   :  { %112 = shalt.err (!%p109_p7)
}
 0x21b   :  { %77 = dma.vmem_to_hbm [thread:$0]  %s75_s1, 128, %s156_s2, [#allocation3]  }
 0x21c   :  { %113 = dma.done.wait [#allocation3], 128  }
 0x21d   :  { %114 = vsyncadd [#allocation3], 4294967168 }
 0x21e   :  { %81 = vsyncpa [#allocation3], 1 }

</bundles_post_ra>
